<compile_context>
chip_gen: v6e
topology: v6e:2x2x1
jax: 0.10.0
libtpu: 0.0.40
codegen_flags: <defaults>
</compile_context>

<pallas_src>
import functools

import jax
import jax.numpy as jnp
from jax import lax
from jax.experimental import pallas as pl
from jax.experimental.pallas import tpu as pltpu


def _patch_embed_kernel(x_ref, w_ref, b_ref, o_ref):
    # x_ref: (TM, K)  patch tile (compute dtype)
    # w_ref: (K, Ep)  projection weight (compute dtype), VMEM-resident
    # b_ref: (1, Ep)  bias (f32), VMEM-resident
    # o_ref: (TM, Ep) output tile
    acc = jnp.dot(x_ref[...], w_ref[...], preferred_element_type=jnp.float32)
    o_ref[...] = (acc + b_ref[...]).astype(o_ref.dtype)


def _round_up(v, m):
    return (v + m - 1) // m * m


_ALIGN = 16  # sublane alignment safe for both 2- and 4-byte tile dtypes


def _choose_tile_m(M, K, Ep, comp_size, out_size, tile_m_cap):
    """Pick the M tile: VMEM-safe on all generations, >=2 grid steps, divides M."""
    if M <= _ALIGN:
        return M                      # full-dim block is always legal
    cap = min(tile_m_cap, M)
    # VMEM: stay under every generation's default scoped limit
    # (v5e 16 MiB, v6e/v7x 32 MiB) -> 12 MiB budget, no vmem_limit_bytes needed.
    budget = 12 * 1024 * 1024
    fixed = K * Ep * comp_size + Ep * 4                 # single-buffered weight + bias
    per_row = 2 * K * comp_size + 2 * Ep * out_size     # double-buffered in/out rows
    cap = min(cap, max(_ALIGN, (budget - fixed) // max(per_row, 1)))
    # Megacore (v7x): give the "parallel" axis at least 2 steps.
    cap = min(cap, _round_up(pl.cdiv(M, 2), _ALIGN))
    cap = max(_ALIGN, cap // _ALIGN * _ALIGN)
    # Prefer a tile that divides M (no wasted ragged last step) unless that
    # would shrink the tile by more than ~25%.
    d = cap
    lo = max(_ALIGN, (3 * cap) // 4)
    while d >= lo:
        if M % d == 0:
            return d
        d -= _ALIGN
    return cap


def patch_embed_naive(x, weight, bias, patch_size, *,
                      compute_dtype=jnp.bfloat16, out_dtype=None,
                      tile_m=1024, out_layout="NCHW"):
    """x: (B, C, H, W).  weight: (E, C, P, P).  bias: (E,).

    out_layout="NCHW" -> (B, E, H//P, W//P), identical to nn.Conv2d(k=P, stride=P).
    out_layout="BNE"  -> (B, nH*nW, E) lane-dense layout (what ViT flattens to);
                         skips the post-kernel transpose.
    out_dtype=None    -> x.dtype (matches nn.Conv2d); pass jnp.bfloat16 for a
                         bf16 ViT to halve output-side HBM traffic.
    """
    B, C, H, W = x.shape
    E = weight.shape[0]
    P = patch_size
    assert H % P == 0 and W % P == 0
    nH, nW = H // P, W // P
    M = B * nH * nW
    K = C * P * P
    out_dtype = x.dtype if out_dtype is None else out_dtype

    # ---- patch extraction; per-patch feature order (c, ph, pw) matches the
    #      PyTorch weight.reshape(E, C*P*P) flattening.  allow_input_fusion
    #      below lets XLA fold this (and the cast) into the kernel's operand
    #      read so the patch matrix is not materialized in HBM. ---------------
    xp = x.reshape(B, C, nH, P, nW, P)
    xp = jnp.transpose(xp, (0, 2, 4, 1, 3, 5))          # (B, nH, nW, C, P, P)
    patches = xp.reshape(M, K).astype(compute_dtype)
    # TODO(synk): for guaranteed zero extra HBM traffic, take row-strips of `x`
    # directly with a BlockSpec and do the (c, ph, pw) relayout in VMEM.

    # ---- lane-dense output: pad E (only) to a multiple of 128 ---------------
    #      K is deliberately NOT padded: the block uses the full K dim (legal),
    #      and padding K would only inflate input-side HBM traffic.
    Ep = _round_up(E, 128)
    w2d = weight.reshape(E, K).T.astype(compute_dtype)  # (K, E)
    if Ep != E:
        w2d = jnp.pad(w2d, ((0, 0), (0, Ep - E)))
    b2d = jnp.pad(bias.astype(jnp.float32), (0, Ep - E)).reshape(1, Ep)

    comp_size = jnp.dtype(compute_dtype).itemsize
    out_size = jnp.dtype(out_dtype).itemsize
    tm = _choose_tile_m(M, K, Ep, comp_size, out_size, tile_m)
    grid_m = pl.cdiv(M, tm)

    cost = pl.CostEstimate(
        flops=2 * M * K * Ep,
        transcendentals=0,
        bytes_accessed=(M * K * comp_size        # patch tiles in (fused read)
                        + K * Ep * comp_size     # weight
                        + Ep * 4                 # bias
                        + M * Ep * out_size),    # out
    )

    out = pl.pallas_call(
        _patch_embed_kernel,
        out_shape=jax.ShapeDtypeStruct((M, Ep), out_dtype),
        grid=(grid_m,),
        in_specs=[
            # patch tile: double-buffered, pipelined over the grid
            pl.BlockSpec((tm, K), lambda i: (i, 0)),
            # weight / bias: constant index_map -> VMEM-resident; single-buffered
            pl.BlockSpec((K, Ep), lambda i: (0, 0), pipeline_mode=pl.Buffered(1)),
            pl.BlockSpec((1, Ep), lambda i: (0, 0), pipeline_mode=pl.Buffered(1)),
        ],
        out_specs=pl.BlockSpec((tm, Ep), lambda i: (i, 0)),
        compiler_params=pltpu.CompilerParams(
            dimension_semantics=("parallel",),
            # Allow XLA to fuse the patch-extraction producer (reshape /
            # transpose / cast) of operand 0 into the kernel's operand read.
            allow_input_fusion=[True, False, False],
        ),
        cost_estimate=cost,
    )(patches, w2d, b2d)

    if Ep != E:
        out = out[:, :E]             # fuses with the reshape/transpose below
    out = out.reshape(B, nH, nW, E)
    if out_layout == "BNE":
        return out.reshape(B, nH * nW, E)
    # NCHW to match nn.Conv2d output of the reference module.
    return jnp.transpose(out, (0, 3, 1, 2))


if __name__ == "__main__":
    # Small, self-consistent shapes: img_size=16, patch_size=4, in_chans=4,
    # embed_dim=32 (PatchEmbedNaive with those ctor args).
    B, C, H, W = 2, 4, 16, 16
    P = 4
    E = 32

    key = jax.random.PRNGKey(0)
    kx, kw, kb = jax.random.split(key, 3)

    x = jax.random.normal(kx, (B, C, H, W), dtype=jnp.float32)
    # Parameter shapes from nn.Conv2d(in_chans, embed_dim, P, stride=P).
    weight = jax.random.normal(kw, (E, C, P, P), dtype=jnp.float32) * 0.02
    bias = jax.random.normal(kb, (E,), dtype=jnp.float32) * 0.02

    # Reference: XLA conv with the same semantics as PyTorch Conv2d (NCHW).
    ref = lax.conv_general_dilated(
        x, weight, window_strides=(P, P), padding="VALID",
        dimension_numbers=("NCHW", "OIHW", "NCHW"),
        precision=lax.Precision.HIGHEST,
    ) + bias.reshape(1, E, 1, 1)
    ref = jax.block_until_ready(ref)

    # jit the wrapper so allow_input_fusion can fold patch extraction into the
    # pallas_call operand read.
    f32_fn = jax.jit(functools.partial(patch_embed_naive, patch_size=P,
                                       compute_dtype=jnp.float32))
    bf16_fn = jax.jit(functools.partial(patch_embed_naive, patch_size=P,
                                        compute_dtype=jnp.bfloat16))

    # Exact-semantics path (f32 matmul inputs).
    out_f32 = jax.block_until_ready(f32_fn(x, weight, bias))
    assert out_f32.shape == (B, E, H // P, W // P), out_f32.shape
    assert jnp.allclose(out_f32, ref, atol=1e-3, rtol=1e-3), "f32 mismatch vs conv"

    # Fast path (bf16 MXU inputs, f32 accumulation + bias).
    out_bf16 = jax.block_until_ready(bf16_fn(x, weight, bias))
    assert out_bf16.shape == (B, E, H // P, W // P), out_bf16.shape
    assert jnp.allclose(out_bf16, ref, atol=3e-2, rtol=3e-2), "bf16 mismatch vs conv"

    print("KERNEL_OK")
</pallas_src>

<mosaic_0001>
module attributes {stable_mosaic.version = 11 : i64} {
  func.func @_patch_embed_kernel(%arg0: i32, %arg1: memref<16x64xf32, #tpu.memory_space<vmem>>, %arg2: memref<64x128xf32, #tpu.memory_space<vmem>>, %arg3: memref<1x128xf32, #tpu.memory_space<vmem>>, %arg4: memref<16x128xf32, #tpu.memory_space<vmem>>) attributes {dimension_semantics = [#tpu.dimension_semantics<parallel>], iteration_bounds = array<i64: 2>, scalar_prefetch = 0 : i64, scratch_operands = 0 : i64, tpu.core_type = #tpu.core_type<tc>, window_params = [{transform_indices = @transform_0, window_bounds = array<i64: 16, 64>}, {pipeline_mode = #tpu.pipeline_mode<synchronous>, transform_indices = @transform_1, window_bounds = array<i64: 64, 128>}, {pipeline_mode = #tpu.pipeline_mode<synchronous>, transform_indices = @transform_2, window_bounds = array<i64: 1, 128>}, {transform_indices = @transform_3, window_bounds = array<i64: 16, 128>}]} {
    %c0 = arith.constant 0 : index
    %c0_0 = arith.constant 0 : index
    %0 = vector.load %arg1[%c0, %c0_0] : memref<16x64xf32, #tpu.memory_space<vmem>>, vector<16x64xf32>
    %c0_1 = arith.constant 0 : index
    %c0_2 = arith.constant 0 : index
    %1 = vector.load %arg2[%c0_1, %c0_2] : memref<64x128xf32, #tpu.memory_space<vmem>>, vector<64x128xf32>
    %cst = arith.constant dense<0.000000e+00> : vector<16x128xf32>
    %2 = tpu.matmul %0, %1, %cst {dimension_numbers = #tpu.dot_dimension_numbers<[1], [0], [0], [1], [0, 0, 1, 1], [], []>} : vector<16x64xf32>, vector<64x128xf32>, vector<16x128xf32> -> vector<16x128xf32>
    %c0_3 = arith.constant 0 : index
    %c0_4 = arith.constant 0 : index
    %3 = vector.load %arg3[%c0_3, %c0_4] : memref<1x128xf32, #tpu.memory_space<vmem>>, vector<1x128xf32>
    %4 = vector.broadcast %3 : vector<1x128xf32> to vector<16x128xf32>
    %5 = arith.addf %2, %4 : vector<16x128xf32>
    %c0_5 = arith.constant 0 : index
    %c0_6 = arith.constant 0 : index
    %6 = vector.load %arg4[%c0_5, %c0_6] : memref<16x128xf32, #tpu.memory_space<vmem>>, vector<16x128xf32>
    tpu.vector_store %arg4[%c0_5, %c0_6], %5 {strides = array<i32>} : memref<16x128xf32, #tpu.memory_space<vmem>>, vector<16x128xf32>,
    return
  }
  func.func @transform_0(%arg0: i32) -> (i32, i32) {
    %c0_i32 = arith.constant 0 : i32
    %c0_i32_0 = arith.constant 0 : i32
    return %arg0, %c0_i32 : i32, i32
  }
  func.func @transform_1(%arg0: i32) -> (i32, i32) {
    %c0_i32 = arith.constant 0 : i32
    %c0_i32_0 = arith.constant 0 : i32
    %c0_i32_1 = arith.constant 0 : i32
    return %c0_i32, %c0_i32_0 : i32, i32
  }
  func.func @transform_2(%arg0: i32) -> (i32, i32) {
    %c0_i32 = arith.constant 0 : i32
    %c0_i32_0 = arith.constant 0 : i32
    %c0_i32_1 = arith.constant 0 : i32
    return %c0_i32, %c0_i32_0 : i32, i32
  }
  func.func @transform_3(%arg0: i32) -> (i32, i32) {
    %c0_i32 = arith.constant 0 : i32
    %c0_i32_0 = arith.constant 0 : i32
    return %arg0, %c0_i32 : i32, i32
  }
}

</mosaic_0001>

<bundles_post_ra>
// kernel: patch_embed_naive.1
= control target key start
LH: loop header
LB: loop body
LE: loop exit
PB: predicated region body
PF: predicated region fallthrough
CT: control target
= control target key end

     0   :  { %8 = vsyncpa [#allocation3], 0  ;;  %s650_s0 = inlined_call_operand.vmem [shape: f32[32,64], index: 0, kind: input, shape index: {}]   ;;  %s651_s1 = inlined_call_operand.vmem [shape: f32[64,128], index: 1, kind: input, shape index: {}]   ;;  %s652_s2 = inlined_call_operand.vmem [shape: f32[1,128], index: 2, kind: input, shape index: {}]   ;;  %s653_s3 = inlined_call_operand.hbm [shape: f32[32,128], index: 3, kind: output, shape index: {}]  }
   0x1   :  { %10 = vsyncpa [#allocation3 + $0x1], 0  ;;  %s520_s12 = smov 0   ;;  %s522_s13 = smov 0  }
   0x2   :  { %s524_s14 = smov 0   ;;  %s526_s15 = smov 0  }
   0x3 LB: > { %s541_s16 = sadd.s32 4294967295, %s495_s15   ;;  %s349_s17 = sadd.s32 4294967294, %s495_s15   ;;  %s495_s15 = sphi %s526_s15, %s659_s15   ;;  %s491_s14 = sphi %s524_s14, %s658_s14   ;;  %s487_s13 = sphi %s522_s13, %s657_s13   ;;  %s483_s12 = sphi %s520_s12, %s656_s12  }
   0x4   : > { %s545_s18 = sadd.s32 1, %s495_s15   ;;  %s91_s19 = sadd.s32 1, %s491_s14 }
   0x5   : > { %s88_s20 = ssub.s32 %s495_s15, %s545_s18  ;;  %p101_p0 = scmp.ne.s32.totalorder %s491_s14, %s487_s13 }
   0x6   : > { %p89_p1 = scmp.eq.s32.totalorder %s88_s20, 0  ;;  %p102_p2 = scmp.eq.s32.totalorder %s541_s16, 1 }
   0x7   : > { %p107_p3 = scmp.ne.s32.totalorder %s487_s13, %s483_s12  ;;  %p108_p4 = scmp.eq.s32.totalorder %s349_s17, 1 }
   0x8   : > { %s556_s21 = scalar_select %p89_p1, %s491_s14, %s91_s19  }
   0x9   : > { %p558_p5 = por %p102_p2, %p101_p0  ;;  %p562_p6 = por %p108_p4, %p107_p3 }
   0xa   : > { %p352_p7 = scmp.ge.s32.totalorder %s495_s15, 1  ;;  %p141_p8 = scmp.lt.s32.totalorder %s495_s15, 3 }
   0xc   : > { %p142_p9 = pnand %p352_p7, %p141_p8 }
   0xd   : > { %s354_s28 = sshll.u32 (!%p142_p9), %s541_s16, 1  ;;  %s162_s27 = sand.u32 (!%p142_p9), 1, %s487_s13  }
   0xe   : > { %145 = sbr.rel (%p142_p9) target bundleno = 247 (0xf7), region = 32  ;;  %p166_p10 = scmp.lt.s32.totalorder (!%p142_p9), %s354_s28, 3 }
   0xf   : > { %s610_s10 = scalar_lea.sflag (!%p142_p9), [#allocation3], %s162_s27 }
  0x13   : > { %v181_v0 = vld [vmem:[%s651_s1 + $0x38] sm:$0xff]  ;;  %v180_v1 = vld [vmem:[%s651_s1 + $0x30] sm:$0xff]  ;;  %v179_v2 = vld [vmem:[%s651_s1 + $0x28] sm:$0xff]  ;;  %s661_s28 = smov (!%p166_p10, %s354_s28), 3  ;;  %vm189_vm0 = vcmask 523264  }
  0x14   : > { %375 = vmatprep.subr.mxu0 %v181_v0  ;;  %v178_v3 = vld [vmem:[%s651_s1 + $0x20] sm:$0xff]  ;;  %s355_s6 = sshll.u32 %s661_s28, 3  ;;  %v177_v4 = vld [vmem:[%s651_s1 + $0x18] sm:$0xff]  ;;  %v176_v6 = vld [vmem:[%s651_s1 + $0x10] sm:$0xff]  ;;  %s353_s28 = sshll.u32 %s162_s27, 4 }
  0x15   : > { %376 = vmatpush3.msra.mxu0 %v181_v0  ;;  %s169_s11 = scalar_lea.vmem %s650_s0, %s355_s6  ;;  %v175_v7 = vld [vmem:[%s651_s1 + $0x8] sm:$0xff]  ;;  %v174_v8 = vld [vmem:[%s651_s1] sm:$0xff]  ;;  %s164_s4 = scalar_lea.vmem [#allocation2], %s353_s28 }
  0x16   : > { %377 = vmatprep.subr.mxu0 %v180_v1  ;;  %v172_v5 = vld [vmem:[%s169_s11] sm:$0xff]  ;;  %v173_v9 = vld [vmem:[%s169_s11 + $0x8] sm:$0xff]  ;;  %s287_s5 = sshll.u32 %s164_s4, 4  ;;  %s364_s6 = sshll.u32 %s541_s16, 8  ;;  %s603_s5 = int_to_ptr.vmem [resolvable:$true] %s287_s5 }
  0x17   : > { %378 = vmatpush3.msra.mxu0 %v180_v1  ;;  %391 = vmatprep.mubr.msk.f32.mxu0 %vm189_vm0, %v172_v5  ;;  %v356_v10 = vld [vmem:[%s652_s2] ss:$0 sm:$0xff]  ;;  %s608_s9 = scalar_lea.hbm %s653_s3, %s364_s6  ;;  %s435_s11 = scalar_lea.vmem %s603_s5, 256 }
  0x18   : > { %379 = vmatprep.subr.mxu0 %v179_v2  ;;  %p436_p11 = scmp.ne.s32.totalorder %s603_s5, %s435_s11  ;;  %s497_s16 = smov [#allocation2]  }
  0x19   : > { %380 = vmatpush3.msra.mxu0 %v179_v2  ;;  %s439_s17 = sshll.u32 %s497_s16, 4  ;;  %s440_s17 = int_to_ptr.vmem [resolvable:$false] %s439_s17 }
  0x1a   : > { %381 = vmatprep.subr.mxu0 %v178_v3  ;;  %p437_p12 = pnand %p436_p11, %p558_p5  ;;  %s441_s19 = scalar_lea.vmem %s440_s17, 512 }
  0x1b   : > { %382 = vmatpush3.msra.mxu0 %v178_v3  ;;  %p442_p0 = scmp.lt.s32.totalorder %s603_s5, %s440_s17  ;;  %p443_p1 = scmp.lt.s32.totalorder %s441_s19, %s435_s11 }
  0x1c   : > { %383 = vmatprep.subr.mxu0 %v177_v4  ;;  %p438_p13 = pneg %p437_p12 }
  0x1d   : > { %384 = vmatpush3.msra.mxu0 %v177_v4  ;;  %p444_p2 = por %p443_p1, %p442_p0 }
  0x1e   : > { %385 = vmatprep.subr.mxu0 %v176_v6 }
  0x1f   : > { %386 = vmatpush3.msra.mxu0 %v176_v6  ;;  %p445_p3 = pnand %p444_p2, %p438_p13 }
  0x20   : > { %387 = vmatprep.subr.mxu0 %v175_v7 }
  0x21   : > { %388 = vmatpush3.msra.mxu0 %v175_v7 }
  0x22   : > { %389 = vmatprep.subr.mxu0 %v174_v8 }
  0x23   : > { %390 = vmatpush3.msra.mxu0 %v174_v8 }
  0x24   : > { %392 = vmatmul.mubr.msk.f32.vlgmr.msra.gmra.mxu0 %vm189_vm0, %v173_v9 }
  0xe4   : > { %v393_v11 = vpop.f32.mrf.mxu0 }
  0xe5   : > { %v268_v12 = vadd.f32 %v393_v11, %v356_v10 }
  0xe6   : > { %v262_v13 = vpop.f32.mrf.mxu0 }
  0xe7   : > { %272 = vst [vmem:[%s164_s4 + $0x8] sm:$0xff] %v268_v12  ;;  %v263_v14 = vadd.f32 %v356_v10, %v262_v13 }
  0xe9   : > { %271 = vst [vmem:[%s164_s4] sm:$0xff] %v263_v14 }
  0xea   : > { %448 = shalt.err (!%p445_p3)
}
  0xeb   : > { %s449_s20 = scalar_lea.hbm %s608_s9, 256  ;;  %s453_s26 = scalar_lea.hbm %s653_s3, 512 }
  0xec   : > { %p450_p4 = scmp.ne.s32.totalorder %s608_s9, %s449_s20  ;;  %p454_p9 = scmp.lt.s32.totalorder %s608_s9, %s653_s3 }
  0xed   : > { %p455_p10 = scmp.lt.s32.totalorder %s453_s26, %s449_s20 }
  0xee   : > { %p451_p7 = pnand %p450_p4, %p558_p5 }
  0xef   : > { %p456_p11 = por %p455_p10, %p454_p9 }
  0xf0   : > { %p452_p8 = pneg %p451_p7 }
  0xf2   : > { %p457_p12 = pnand %p456_p11, %p452_p8 }
  0xf4   : > { %460 = shalt.err (!%p457_p12)
}
  0xf5   : > { %s498_s29 = smov 128   ;;  %s499_s30 = smov 8  }
  0xf6   : > { %394 = dma.vmem_to_hbm [thread:$0]  (%p558_p5), %s603_s5, 256, %s608_s9, %s610_s10, %s498_s29, %s498_s29, %s499_s30  }
  0xf7 PF: > { %p400_p13 = scmp.ge.s32.totalorder %s495_s15, 2  ;;  %s302_s4 = sand.u32 1, %s483_s12  }
  0xf8   : > { %s303_s6 = scalar_lea.sflag [#allocation3], %s302_s4 }
  0xf9   : > { %p397_p0 = pnand %p400_p13, %p562_p6 }
  0xfb   : > { %p398_p1 = pneg %p397_p0 }
  0xfd   : > { %478 = dma.done.wait (%p398_p1), %s303_s6, 256  }
  0xfe   : > { %480 = vsyncadd (%p398_p1), %s303_s6, 4294967040  ;;  %p13_p2 = scmp.ge.s32.totalorder %s545_s18, 4   ;;  %s656_s12 = smov %s487_s13 }
  0xff   : > { %s657_s13 = smov %s491_s14  ;;  %s658_s14 = smov %s556_s21 }
 0x100   : > { %s659_s15 = smov %s545_s18  ;;  %15 = sbr.rel (!%p13_p2) target bundleno = 3 (0x3), region = 67 }
 0x105   :  { %308 = vsyncpa [#allocation3], 1 }
 0x106   :  { %310 = vsyncpa [#allocation3 + $0x1], 1 }

</bundles_post_ra>
